<compile_context>
chip_gen: v7x
topology: tpu7x:2x2x1
jax: 0.10.0
libtpu: 0.0.40
codegen_flags: <defaults>
</compile_context>

<pallas_src>
import jax
import jax.numpy as jnp
from jax.experimental import pallas as pl
from jax.experimental.pallas import tpu as pltpu

LANE = 128  # pad batch and all feature dims to multiples of this


def mlp_kernel(x_ref, w1_ref, b1_ref, w2_ref, b2_ref, w3_ref, b3_ref, o_ref):
    # fc1 + relu  (bf16 MXU operands, f32 accumulation, f32 elementwise)
    h1 = jnp.dot(x_ref[...], w1_ref[...], preferred_element_type=jnp.float32)
    h1 = jnp.maximum(h1 + b1_ref[...], 0.0)
    # fc2 + relu
    h2 = jnp.dot(h1.astype(jnp.bfloat16), w2_ref[...],
                 preferred_element_type=jnp.float32)
    h2 = jnp.maximum(h2 + b2_ref[...], 0.0)
    # fc3 + relu: 1-column projection done on the VPU/XLU (mul + row reduce),
    # bias read as an SMEM scalar. Padded lanes of h2 / w3 are zero.
    s = jnp.sum(h2 * w3_ref[...], axis=-1, keepdims=True)       # (B, 1) f32
    y = jnp.maximum(s + b3_ref[0, 0], 0.0)                       # (B, 1) f32
    # Lane-dense unmasked store: broadcast the column across all 128 lanes;
    # the wrapper keeps only column 0.
    o_ref[...] = jnp.broadcast_to(y, o_ref.shape).astype(o_ref.dtype)


def _round_up(n, m):
    return ((n + m - 1) // m) * m


def prepare_params(params):
    """Zero-pad weights/biases to (128,128)/(1,128) tiles; matmul weights -> bf16."""
    w1, b1, w2, b2, w3, b3 = params

    def pad_w(w, dtype):
        kp, np_ = _round_up(w.shape[0], LANE), _round_up(w.shape[1], LANE)
        return jnp.zeros((kp, np_), dtype).at[: w.shape[0], : w.shape[1]].set(
            w.astype(dtype))

    def pad_b(b):
        np_ = _round_up(b.shape[1], LANE)
        return jnp.zeros((1, np_), jnp.float32).at[:, : b.shape[1]].set(b)

    w1p = pad_w(w1, jnp.bfloat16)
    w2p = pad_w(w2, jnp.bfloat16)
    b1p = pad_b(b1)
    b2p = pad_b(b2)
    # fc3 weight as an f32 lane row (used on the VPU), bias as an SMEM scalar.
    w3row = jnp.zeros((1, LANE), jnp.float32).at[0, : w3.shape[0]].set(w3[:, 0])
    b3s = jnp.asarray(b3, jnp.float32).reshape(1, 1)
    return w1p, b1p, w2p, b2p, w3row, b3s


def simple_net_forward(x, prepared):
    w1p, b1p, w2p, b2p, w3row, b3s = prepared
    B, Din = x.shape
    Bp = _round_up(max(B, 8), LANE)
    K1 = w1p.shape[0]

    # Pad batch + input-feature dims and cast to bf16 once, outside the kernel.
    xp = jnp.zeros((Bp, K1), jnp.bfloat16).at[:B, :Din].set(
        x.astype(jnp.bfloat16))

    N_out = LANE  # lane-dense padded output; only column 0 is meaningful
    full = lambda a: pl.BlockSpec(a.shape, lambda: (0,) * a.ndim)

    flops = (2 * Bp * K1 * w1p.shape[1]
             + 2 * Bp * w2p.shape[0] * w2p.shape[1]
             + 4 * Bp * LANE)
    bytes_accessed = (xp.size * 2 + w1p.size * 2 + w2p.size * 2
                      + (b1p.size + b2p.size + w3row.size + b3s.size) * 4
                      + Bp * N_out * 4)

    out_pad = pl.pallas_call(
        mlp_kernel,
        out_shape=jax.ShapeDtypeStruct((Bp, N_out), jnp.float32),
        grid=(),  # tiny problem: single shot, no pipeline overhead
        in_specs=[full(xp), full(w1p), full(b1p), full(w2p), full(b2p),
                  full(w3row),
                  pl.BlockSpec(memory_space=pltpu.MemorySpace.SMEM)],
        out_specs=pl.BlockSpec((Bp, N_out), lambda: (0, 0)),
        cost_estimate=pl.CostEstimate(flops=flops, transcendentals=0,
                                      bytes_accessed=bytes_accessed),
    )(xp, w1p, b1p, w2p, b2p, w3row, b3s)

    return out_pad[:B, :1]


def init_params(key):
    # Deterministic init mimicking nn.Linear's U(-1/sqrt(fan_in), +1/sqrt(fan_in)),
    # stored as (in, out) weights and (1, out) biases so y = x @ W + b.
    dims = [(10, 50), (50, 20), (20, 1)]
    params = []
    for fan_in, fan_out in dims:
        kw, kb, key = jax.random.split(key, 3)
        bound = 1.0 / jnp.sqrt(fan_in)
        w = jax.random.uniform(kw, (fan_in, fan_out), jnp.float32, -bound, bound)
        b = jax.random.uniform(kb, (1, fan_out), jnp.float32, -bound, bound)
        params += [w, b]
    return tuple(params)


def reference_forward(x, params):
    # Pure f32 reference matching the PyTorch module (ReLU after every layer,
    # including fc3, exactly as in the original forward()).
    w1, b1, w2, b2, w3, b3 = params
    h = jnp.maximum(x @ w1 + b1, 0.0)
    h = jnp.maximum(h @ w2 + b2, 0.0)
    h = jnp.maximum(h @ w3 + b3, 0.0)
    return h


if __name__ == "__main__":
    key = jax.random.PRNGKey(0)
    kx, kp = jax.random.split(key)
    x = jax.random.normal(kx, (100, 10), jnp.float32)
    params = init_params(kp)
    prepared = prepare_params(params)

    out = jax.block_until_ready(simple_net_forward(x, prepared))

    ref = reference_forward(x, params)
    assert out.shape == (100, 1), out.shape
    # bf16 MXU operands -> compare against the f32 reference at bf16 tolerance.
    err = float(jnp.max(jnp.abs(out - ref)))
    assert jnp.allclose(out, ref, atol=2e-2, rtol=2e-2), err
    print("KERNEL_OK")
</pallas_src>

<mosaic_0001>
module attributes {stable_mosaic.version = 11 : i64} {
  func.func @mlp_kernel(%arg0: memref<128x128xbf16, #tpu.memory_space<vmem>>, %arg1: memref<128x128xbf16, #tpu.memory_space<vmem>>, %arg2: memref<1x128xf32, #tpu.memory_space<vmem>>, %arg3: memref<128x128xbf16, #tpu.memory_space<vmem>>, %arg4: memref<1x128xf32, #tpu.memory_space<vmem>>, %arg5: memref<1x128xf32, #tpu.memory_space<vmem>>, %arg6: memref<1x1xf32, #tpu.memory_space<smem>>, %arg7: memref<128x128xf32, #tpu.memory_space<vmem>>) attributes {dimension_semantics = [], scalar_prefetch = 0 : i64, scratch_operands = 0 : i64, tpu.core_type = #tpu.core_type<tc>} {
    %c0 = arith.constant 0 : index
    %c0_0 = arith.constant 0 : index
    %0 = vector.load %arg0[%c0, %c0_0] : memref<128x128xbf16, #tpu.memory_space<vmem>>, vector<128x128xbf16>
    %c0_1 = arith.constant 0 : index
    %c0_2 = arith.constant 0 : index
    %1 = vector.load %arg1[%c0_1, %c0_2] : memref<128x128xbf16, #tpu.memory_space<vmem>>, vector<128x128xbf16>
    %cst = arith.constant dense<0.000000e+00> : vector<128x128xf32>
    %2 = tpu.matmul %0, %1, %cst {dimension_numbers = #tpu.dot_dimension_numbers<[1], [0], [0], [1], [0, 0, 1, 1], [], []>} : vector<128x128xbf16>, vector<128x128xbf16>, vector<128x128xf32> -> vector<128x128xf32>
    %c0_3 = arith.constant 0 : index
    %c0_4 = arith.constant 0 : index
    %3 = vector.load %arg2[%c0_3, %c0_4] : memref<1x128xf32, #tpu.memory_space<vmem>>, vector<1x128xf32>
    %4 = vector.broadcast %3 : vector<1x128xf32> to vector<128x128xf32>
    %5 = arith.addf %2, %4 : vector<128x128xf32>
    %cst_5 = arith.constant 0.000000e+00 : f32
    %6 = vector.broadcast %cst_5 : f32 to vector<128x128xf32>
    %7 = arith.maximumf %5, %6 : vector<128x128xf32>
    %8 = arith.truncf %7 : vector<128x128xf32> to vector<128x128xbf16>
    %c0_6 = arith.constant 0 : index
    %c0_7 = arith.constant 0 : index
    %9 = vector.load %arg3[%c0_6, %c0_7] : memref<128x128xbf16, #tpu.memory_space<vmem>>, vector<128x128xbf16>
    %cst_8 = arith.constant dense<0.000000e+00> : vector<128x128xf32>
    %10 = tpu.matmul %8, %9, %cst_8 {dimension_numbers = #tpu.dot_dimension_numbers<[1], [0], [0], [1], [0, 0, 1, 1], [], []>} : vector<128x128xbf16>, vector<128x128xbf16>, vector<128x128xf32> -> vector<128x128xf32>
    %c0_9 = arith.constant 0 : index
    %c0_10 = arith.constant 0 : index
    %11 = vector.load %arg4[%c0_9, %c0_10] : memref<1x128xf32, #tpu.memory_space<vmem>>, vector<1x128xf32>
    %12 = vector.broadcast %11 : vector<1x128xf32> to vector<128x128xf32>
    %13 = arith.addf %10, %12 : vector<128x128xf32>
    %cst_11 = arith.constant 0.000000e+00 : f32
    %14 = vector.broadcast %cst_11 : f32 to vector<128x128xf32>
    %15 = arith.maximumf %13, %14 : vector<128x128xf32>
    %c0_12 = arith.constant 0 : index
    %c0_13 = arith.constant 0 : index
    %16 = vector.load %arg5[%c0_12, %c0_13] : memref<1x128xf32, #tpu.memory_space<vmem>>, vector<1x128xf32>
    %17 = vector.broadcast %16 : vector<1x128xf32> to vector<128x128xf32>
    %18 = arith.mulf %15, %17 : vector<128x128xf32>
    %cst_14 = arith.constant dense<0.000000e+00> : vector<128xf32>
    %19 = vector.multi_reduction <add>, %18, %cst_14 [1] : vector<128x128xf32> to vector<128xf32>
    %20 = vector.shape_cast %19 : vector<128xf32> to vector<128x1xf32>
    %c0_15 = arith.constant 0 : index
    %c0_16 = arith.constant 0 : index
    %21 = memref.load %arg6[%c0_15, %c0_16] : memref<1x1xf32, #tpu.memory_space<smem>>
    %22 = vector.broadcast %21 : f32 to vector<128x1xf32>
    %23 = arith.addf %20, %22 : vector<128x1xf32>
    %cst_17 = arith.constant 0.000000e+00 : f32
    %24 = vector.broadcast %cst_17 : f32 to vector<128x1xf32>
    %25 = arith.maximumf %23, %24 : vector<128x1xf32>
    %26 = vector.shape_cast %25 : vector<128x1xf32> to vector<128x1xf32>
    %27 = vector.broadcast %26 : vector<128x1xf32> to vector<128x128xf32>
    %c0_18 = arith.constant 0 : index
    %c0_19 = arith.constant 0 : index
    %28 = vector.load %arg7[%c0_18, %c0_19] : memref<128x128xf32, #tpu.memory_space<vmem>>, vector<128x128xf32>
    tpu.vector_store %arg7[%c0_18, %c0_19], %27 {strides = array<i32>} : memref<128x128xf32, #tpu.memory_space<vmem>>, vector<128x128xf32>,
    return
  }
}

</mosaic_0001>

<bundles_post_ra>
// kernel: tpu_custom_call.1
= control target key start
LH: loop header
LB: loop body
LE: loop exit
PB: predicated region body
PF: predicated region fallthrough
CT: control target
= control target key end

     0   :  { %13 = vsyncpa [#allocation4], 0  ;;  %s1060_s0 = inlined_call_operand.hbm [shape: bf16[128,128], index: 0, kind: input, shape index: {}]   ;;  %s1061_s1 = inlined_call_operand.hbm [shape: bf16[128,128], index: 1, kind: input, shape index: {}]   ;;  %s1062_s2 = inlined_call_operand.vmem [shape: f32[1,128], index: 2, kind: input, shape index: {}]   ;;  %s1063_s3 = inlined_call_operand.hbm [shape: bf16[128,128], index: 3, kind: input, shape index: {}]   ;;  %s1064_s4 = inlined_call_operand.vmem [shape: f32[1,128], index: 4, kind: input, shape index: {}]   ;;  %s1065_s5 = inlined_call_operand.vmem [shape: f32[1,128], index: 5, kind: input, shape index: {}]   ;;  %s1066_s6 = inlined_call_operand.<no memory space> [shape: f32[1,1], index: 6, kind: input, shape index: {}]   ;;  %s1067_s7 = inlined_call_operand.hbm [shape: f32[128,128], index: 7, kind: output, shape index: {}]  }
   0x1   :  { %14 = vsyncpa [#allocation7], 0 }
   0x2   :  { %15 = vsyncpa [#allocation5], 0  ;;  %s882_s24 = smov [#allocation6]   ;;  %s883_s26 = smov [#allocation3]  }
   0x3   :  { %s33_s25 = sshll.u32 %s882_s24, 4  ;;  %s21_s27 = sshll.u32 %s883_s26, 4  ;;  %s34_s25 = int_to_ptr.vmem [resolvable:$true] %s33_s25  ;;  %s930_s27 = int_to_ptr.vmem [resolvable:$true] %s21_s27 }
   0x4   :  { %s788_s30 = scalar_lea.hbm %s1061_s1, 1024 }
   0x5   :  { %p789_p0 = scmp.ne.s32.totalorder %s1061_s1, %s788_s30  ;;  %p792_p1 = scmp.lt.u32.totalorder %s788_s30, %s1061_s1 }
   0x7   :  { %p794_p2 = pnand %p792_p1, %p789_p0 }
   0x9   :  { %797 = shalt.err (!%p794_p2)
}
   0xa   :  { %s798_s12 = scalar_lea.vmem %s34_s25, 1024  ;;  %p803_p4 = scmp.lt.s32.totalorder %s34_s25, %s34_s25 }
   0xb   :  { %p799_p3 = scmp.ne.s32.totalorder %s34_s25, %s798_s12  ;;  %p804_p5 = scmp.lt.s32.totalorder %s798_s12, %s798_s12 }
   0xd   :  { %p805_p6 = por %p804_p5, %p803_p4 }
   0xf   :  { %p806_p7 = pnand %p805_p6, %p799_p3 }
  0x11   :  { %809 = shalt.err (!%p806_p7)
}
  0x12   :  { %s884_s13 = smov 64   ;;  %s885_s14 = smov 4  }
  0x13   :  { %39 = dma.hbm_to_vmem [thread:$0]  %s1061_s1, 1024, %s34_s25, [#allocation7], %s884_s13, %s884_s13, %s885_s14  }
  0x14   :  { %s810_s19 = scalar_lea.hbm %s1060_s0, 1024 }
  0x15   :  { %p811_p8 = scmp.ne.s32.totalorder %s1060_s0, %s810_s19  ;;  %p814_p9 = scmp.lt.u32.totalorder %s810_s19, %s1060_s0 }
  0x17   :  { %p816_p10 = pnand %p814_p9, %p811_p8 }
  0x19   :  { %819 = shalt.err (!%p816_p10)
}
  0x1a   :  { %s820_s24 = scalar_lea.vmem %s930_s27, 1024  ;;  %p825_p12 = scmp.lt.s32.totalorder %s930_s27, %s930_s27 }
  0x1b   :  { %p821_p11 = scmp.ne.s32.totalorder %s930_s27, %s820_s24  ;;  %p826_p13 = scmp.lt.s32.totalorder %s820_s24, %s820_s24 }
  0x1d   :  { %p827_p0 = por %p826_p13, %p825_p12 }
  0x1f   :  { %p828_p1 = pnand %p827_p0, %p821_p11 }
  0x21   :  { %831 = shalt.err (!%p828_p1)
}
  0x22   :  { %27 = dma.hbm_to_vmem [thread:$0]  %s1060_s0, 1024, %s930_s27, [#allocation4], %s884_s13, %s884_s13, %s885_s14  }
  0x23   :  { %s886_s26 = smov [#allocation8]   ;;  %s832_s8 = scalar_lea.hbm %s1063_s3, 1024 }
  0x24   :  { %s47_s28 = sshll.u32 %s886_s26, 4  ;;  %p833_p2 = scmp.ne.s32.totalorder %s1063_s3, %s832_s8  ;;  %s48_s28 = int_to_ptr.vmem [resolvable:$true] %s47_s28 }
  0x25   :  { %p836_p3 = scmp.lt.u32.totalorder %s832_s8, %s1063_s3 }
  0x27   :  { %p838_p4 = pnand %p836_p3, %p833_p2 }
  0x29   :  { %841 = shalt.err (!%p838_p4)
}
  0x2a   :  { %s842_s15 = scalar_lea.vmem %s48_s28, 1024  ;;  %p847_p6 = scmp.lt.s32.totalorder %s48_s28, %s48_s28 }
  0x2b   :  { %p843_p5 = scmp.ne.s32.totalorder %s48_s28, %s842_s15  ;;  %p848_p7 = scmp.lt.s32.totalorder %s842_s15, %s842_s15 }
  0x2d   :  { %p849_p8 = por %p848_p7, %p847_p6 }
  0x2f   :  { %p850_p9 = pnand %p849_p8, %p843_p5 }
  0x31   :  { %853 = shalt.err (!%p850_p9)
}
  0x32   :  { %53 = dma.hbm_to_vmem [thread:$0]  %s1063_s3, 1024, %s48_s28, [#allocation7], %s884_s13, %s884_s13, %s885_s14  }
  0x33   :  { %876 = dma.done.wait [#allocation4], 1024  }
  0x34   :  { %877 = vsyncadd [#allocation4], 4294966272 }
  0x35   :  { %878 = dma.done.wait [#allocation7], 2048  }
  0x36   :  { %879 = vsyncadd [#allocation7], 4294965248  ;;  %v764_v0 = vld [vmem:[#allocation6] sm:$0xff]   ;;  %v765_v1 = vld [vmem:[#allocation6 + $0x8] sm:$0xff]  }
  0x37   :  { %692 = vmatprep.subr.bf16.mxu0 %v764_v0  ;;  %v766_v2 = vld [vmem:[#allocation6 + $0x10] sm:$0xff]   ;;  %v767_v3 = vld [vmem:[#allocation6 + $0x18] sm:$0xff]   ;;  %v772_v4 = vld [vmem:[#allocation3] sm:$0xff]  }
  0x38   :  { %693 = vmatpush3.bf16.msra.mxu0 %v764_v0  ;;  %708 = vmatprep.mubr.bf16.mxu0 %v772_v4  ;;  %v768_v5 = vld [vmem:[#allocation6 + $0x20] sm:$0xff]   ;;  %v769_v6 = vld [vmem:[#allocation6 + $0x28] sm:$0xff]   ;;  %v770_v9 = vld [vmem:[#allocation6 + $0x30] sm:$0xff]  }
  0x39   :  { %694 = vmatprep.subr.bf16.mxu0 %v765_v1  ;;  %v780_v7 = vld [vmem:[#allocation8] sm:$0xff]   ;;  %v781_v8 = vld [vmem:[#allocation8 + $0x8] sm:$0xff]   ;;  %v782_v10 = vld [vmem:[#allocation8 + $0x10] sm:$0xff]  }
  0x3a   :  { %724 = vmatprep.subr.bf16.mxu1 %v780_v7  ;;  %v771_v11 = vld [vmem:[#allocation6 + $0x38] sm:$0xff]   ;;  %v784_v13 = vld [vmem:[#allocation8 + $0x20] sm:$0xff]   ;;  %v773_v14 = vld [vmem:[#allocation3 + $0x8] sm:$0xff]  }
  0x3b   :  { %725 = vmatpush3.bf16.msra.mxu1 %v780_v7  ;;  %v783_v12 = vld [vmem:[#allocation8 + $0x18] sm:$0xff]   ;;  %v774_v15 = vld [vmem:[#allocation3 + $0x10] sm:$0xff]   ;;  %v785_v16 = vld [vmem:[#allocation8 + $0x28] sm:$0xff]  }
  0x3c   :  { %695 = vmatpush3.bf16.msra.mxu0 %v765_v1  ;;  %726 = vmatprep.subr.bf16.mxu1 %v781_v8  ;;  %v775_v17 = vld [vmem:[#allocation3 + $0x18] sm:$0xff]   ;;  %v776_v18 = vld [vmem:[#allocation3 + $0x20] sm:$0xff]   ;;  %v777_v19 = vld [vmem:[#allocation3 + $0x28] sm:$0xff]  }
  0x3d   :  { %696 = vmatprep.subr.bf16.mxu0 %v766_v2  ;;  %v778_v20 = vld [vmem:[#allocation3 + $0x30] sm:$0xff]   ;;  %v779_v21 = vld [vmem:[#allocation3 + $0x38] sm:$0xff]   ;;  %v633_v24 = vld [vmem:[%s1062_s2] ss:$0 sm:$0xff] }
  0x3e   :  { %v786_v22 = vld [vmem:[#allocation8 + $0x30] sm:$0xff]   ;;  %v787_v23 = vld [vmem:[#allocation8 + $0x38] sm:$0xff]  }
  0x3f   :  { %727 = vmatpush3.bf16.msra.mxu1 %v781_v8 }
  0x40   :  { %697 = vmatpush3.bf16.msra.mxu0 %v766_v2  ;;  %728 = vmatprep.subr.bf16.mxu1 %v782_v10 }
  0x41   :  { %698 = vmatprep.subr.bf16.mxu0 %v767_v3 }
  0x43   :  { %729 = vmatpush3.bf16.msra.mxu1 %v782_v10 }
  0x44   :  { %699 = vmatpush3.bf16.msra.mxu0 %v767_v3  ;;  %730 = vmatprep.subr.bf16.mxu1 %v783_v12 }
  0x45   :  { %700 = vmatprep.subr.bf16.mxu0 %v768_v5 }
  0x47   :  { %731 = vmatpush3.bf16.msra.mxu1 %v783_v12 }
  0x48   :  { %701 = vmatpush3.bf16.msra.mxu0 %v768_v5  ;;  %732 = vmatprep.subr.bf16.mxu1 %v784_v13 }
  0x49   :  { %702 = vmatprep.subr.bf16.mxu0 %v769_v6 }
  0x4b   :  { %733 = vmatpush3.bf16.msra.mxu1 %v784_v13 }
  0x4c   :  { %703 = vmatpush3.bf16.msra.mxu0 %v769_v6  ;;  %734 = vmatprep.subr.bf16.mxu1 %v785_v16 }
  0x4d   :  { %704 = vmatprep.subr.bf16.mxu0 %v770_v9 }
  0x4f   :  { %735 = vmatpush3.bf16.msra.mxu1 %v785_v16 }
  0x50   :  { %705 = vmatpush3.bf16.msra.mxu0 %v770_v9  ;;  %736 = vmatprep.subr.bf16.mxu1 %v786_v22 }
  0x51   :  { %706 = vmatprep.subr.bf16.mxu0 %v771_v11 }
  0x53   :  { %737 = vmatpush3.bf16.msra.mxu1 %v786_v22 }
  0x54   :  { %707 = vmatpush3.bf16.msra.mxu0 %v771_v11  ;;  %738 = vmatprep.subr.bf16.mxu1 %v787_v23 }
  0x57   :  { %709 = vmatmul.mubr.bf16.vlgmr.msra.gmra.mrb[0].mxu0 %v773_v14  ;;  %739 = vmatpush3.bf16.msra.mxu1 %v787_v23  ;;  %v995_v23 = vld [vmem:[%s1065_s5] ss:$0 sm:$0xff] }
  0x58   :  { %712 = vmatprep.mubr.bf16.mxu0 %v774_v15 }
  0x5f   :  { %713 = vmatmul.mubr.bf16.gmra.mrb[4].mxu0 %v775_v17  ;;  %v988_v17 = vld [vmem:[%s1064_s4] ss:$0 sm:$0xff] }
  0x60   :  { %716 = vmatprep.mubr.bf16.mxu0 %v776_v18 }
  0x67   :  { %717 = vmatmul.mubr.bf16.gmra.mrb[8].mxu0 %v777_v19 }
  0x68   :  { %720 = vmatprep.mubr.bf16.mxu0 %v778_v20 }
  0x6f   :  { %721 = vmatmul.mubr.bf16.gmra.mrb[12].mxu0 %v779_v21 }
 0x12a   :  { %v710_v25 = vpop.f32.mrb[0].mxu0 }
 0x12b   :  { %v248_v26 = vadd.f32 %v710_v25, %v633_v24  ;;  %v239_v27 = vpop.f32.mrb[1].mxu0 }
 0x12c   :  { %v240_v28 = vadd.f32 %v633_v24, %v239_v27  ;;  %v711_v29 = vpop.f32.mrb[2].mxu0 }
 0x12d   :  { %v251_v30 = vadd.f32 %v711_v29, %v633_v24  ;;  %v242_v31 = vpop.f32.mrb[3].mxu0  ;;  %v304_v33 = vmax.f32 %v248_v26, 0.0 }
 0x12e   :  { %v243_v32 = vadd.f32 %v633_v24, %v242_v31  ;;  %v302_v35 = vmax.f32 %v240_v28, 0.0 }
 0x12f   :  { %v305_v34 = vmax.f32 %v251_v30, 0.0 }
 0x130   :  { %v303_v36 = vmax.f32 %v243_v32, 0.0 }
 0x131   :  { %v319_v37 = vpack.c.bf16 %v305_v34, %v304_v33 }
 0x132   :  { %v714_v38 = vpop.f32.mrb[4].mxu0  ;;  %v318_v39 = vpack.c.bf16 %v303_v36, %v302_v35 }
 0x133   :  { %v264_v40 = vadd.f32 %v714_v38, %v633_v24  ;;  %v255_v41 = vpop.f32.mrb[5].mxu0 }
 0x134   :  { %v256_v42 = vadd.f32 %v633_v24, %v255_v41  ;;  %v715_v43 = vpop.f32.mrb[6].mxu0  ;;  %740 = vmatprep.mubr.bf16.mxu1 %v318_v39 }
 0x135   :  { %v267_v44 = vadd.f32 %v715_v43, %v633_v24  ;;  %v258_v45 = vpop.f32.mrb[7].mxu0  ;;  %741 = vmatmul.mubr.bf16.vlgmr.msra.gmra.mrb[0].mxu1 %v319_v37  ;;  %v308_v47 = vmax.f32 %v264_v40, 0.0 }
 0x136   :  { %v259_v46 = vadd.f32 %v633_v24, %v258_v45  ;;  %v306_v49 = vmax.f32 %v256_v42, 0.0 }
 0x137   :  { %v309_v48 = vmax.f32 %v267_v44, 0.0 }
 0x138   :  { %v307_v50 = vmax.f32 %v259_v46, 0.0 }
 0x139   :  { %v321_v51 = vpack.c.bf16 %v309_v48, %v308_v47 }
 0x13a   :  { %v320_v52 = vpack.c.bf16 %v307_v50, %v306_v49  ;;  %v718_v53 = vpop.f32.mrb[8].mxu0 }
 0x13b   :  { %v280_v54 = vadd.f32 %v718_v53, %v633_v24  ;;  %v271_v55 = vpop.f32.mrb[9].mxu0 }
 0x13c   :  { %v272_v56 = vadd.f32 %v633_v24, %v271_v55  ;;  %v719_v57 = vpop.f32.mrb[10].mxu0  ;;  %744 = vmatprep.mubr.bf16.mxu1 %v320_v52 }
 0x13d   :  { %v283_v58 = vadd.f32 %v719_v57, %v633_v24  ;;  %v274_v59 = vpop.f32.mrb[11].mxu0  ;;  %745 = vmatmul.mubr.bf16.gmra.mrb[4].mxu1 %v321_v51  ;;  %v312_v61 = vmax.f32 %v280_v54, 0.0 }
 0x13e   :  { %v275_v60 = vadd.f32 %v633_v24, %v274_v59  ;;  %v310_v63 = vmax.f32 %v272_v56, 0.0 }
 0x13f   :  { %v313_v62 = vmax.f32 %v283_v58, 0.0 }
 0x140   :  { %v311_v0 = vmax.f32 %v275_v60, 0.0 }
 0x141   :  { %v323_v1 = vpack.c.bf16 %v313_v62, %v312_v61 }
 0x142   :  { %v322_v2 = vpack.c.bf16 %v311_v0, %v310_v63  ;;  %v722_v3 = vpop.f32.mrb[12].mxu0 }
 0x143   :  { %v296_v4 = vadd.f32 %v722_v3, %v633_v24  ;;  %v287_v5 = vpop.f32.mrb[13].mxu0 }
 0x144   :  { %v288_v6 = vadd.f32 %v633_v24, %v287_v5  ;;  %v723_v7 = vpop.f32.mrb[14].mxu0  ;;  %748 = vmatprep.mubr.bf16.mxu1 %v322_v2 }
 0x145   :  { %v299_v8 = vadd.f32 %v723_v7, %v633_v24  ;;  %v290_v9 = vpop.f32.mrb[15].mxu0  ;;  %749 = vmatmul.mubr.bf16.gmra.mrb[8].mxu1 %v323_v1  ;;  %v316_v11 = vmax.f32 %v296_v4, 0.0 }
 0x146   :  { %v291_v10 = vadd.f32 %v633_v24, %v290_v9  ;;  %v314_v13 = vmax.f32 %v288_v6, 0.0 }
 0x147   :  { %v317_v12 = vmax.f32 %v299_v8, 0.0 }
 0x148   :  { %v315_v14 = vmax.f32 %v291_v10, 0.0 }
 0x149   :  { %v325_v15 = vpack.c.bf16 %v317_v12, %v316_v11 }
 0x14a   :  { %v324_v16 = vpack.c.bf16 %v315_v14, %v314_v13 }
 0x14c   :  { %752 = vmatprep.mubr.bf16.mxu1 %v324_v16 }
 0x14d   :  { %753 = vmatmul.mubr.bf16.gmra.mrb[12].mxu1 %v325_v15 }
 0x208   :  { %v742_v18 = vpop.f32.mrb[0].mxu1 }
 0x209   :  { %v440_v19 = vadd.f32 %v742_v18, %v988_v17  ;;  %v431_v20 = vpop.f32.mrb[1].mxu1 }
 0x20a   :  { %v432_v21 = vadd.f32 %v988_v17, %v431_v20  ;;  %v743_v22 = vpop.f32.mrb[2].mxu1 }
 0x20b   :  { %v496_v24 = vmax.f32 %v440_v19, 0.0  ;;  %v443_v25 = vadd.f32 %v743_v22, %v988_v17  ;;  %v434_v26 = vpop.f32.mrb[3].mxu1 }
 0x20c   :  { %v494_v27 = vmax.f32 %v432_v21, 0.0  ;;  %v435_v28 = vadd.f32 %v988_v17, %v434_v26 }
 0x20d   :  { %v497_v29 = vmax.f32 %v443_v25, 0.0  ;;  %v519_v30 = vmul.f32 %v995_v23, %v496_v24 }
 0x20e   :  { %v495_v31 = vmax.f32 %v435_v28, 0.0  ;;  %v517_v32 = vmul.f32 %v995_v23, %v494_v27 }
 0x20f   :  { %537 = vadd.xlane.f32.xlu1 %v519_v30  ;;  %v520_v36 = vmul.f32 %v995_v23, %v497_v29 }
 0x210   :  { %v746_v33 = vpop.f32.mrb[4].mxu1  ;;  %533 = vadd.xlane.f32.xlu0 %v517_v32  ;;  %v518_v39 = vmul.f32 %v995_v23, %v495_v31 }
 0x211   :  { %v456_v34 = vadd.f32 %v746_v33, %v988_v17  ;;  %v447_v35 = vpop.f32.mrb[5].mxu1 }
 0x212   :  { %v448_v37 = vadd.f32 %v988_v17, %v447_v35  ;;  %v747_v38 = vpop.f32.mrb[6].mxu1 }
 0x213   :  { %v500_v40 = vmax.f32 %v456_v34, 0.0  ;;  %v459_v41 = vadd.f32 %v747_v38, %v988_v17  ;;  %539 = vadd.xlane.f32.xlu1 %v520_v36  ;;  %v450_v42 = vpop.f32.mrb[7].mxu1 }
 0x214   :  { %v451_v43 = vadd.f32 %v988_v17, %v450_v42  ;;  %535 = vadd.xlane.f32.xlu0 %v518_v39  ;;  %v498_v46 = vmax.f32 %v448_v37, 0.0 }
 0x215   :  { %v501_v44 = vmax.f32 %v459_v41, 0.0  ;;  %v523_v45 = vmul.f32 %v995_v23, %v500_v40 }
 0x216   :  { %v499_v47 = vmax.f32 %v451_v43, 0.0  ;;  %v521_v54 = vmul.f32 %v995_v23, %v498_v46 }
 0x217   :  { %v524_v48 = vmul.f32 %v995_v23, %v501_v44 }
 0x218   :  { %v750_v49 = vpop.f32.mrb[8].mxu1  ;;  %545 = vadd.xlane.f32.xlu0 %v523_v45  ;;  %v522_v58 = vmul.f32 %v995_v23, %v499_v47 }
 0x219   :  { %v472_v50 = vadd.f32 %v750_v49, %v988_v17  ;;  %547 = vadd.xlane.f32.xlu1 %v524_v48  ;;  %v463_v51 = vpop.f32.mrb[9].mxu1 }
 0x21a   :  { %v464_v52 = vadd.f32 %v988_v17, %v463_v51  ;;  %v751_v53 = vpop.f32.mrb[10].mxu1 }
 0x21b   :  { %v504_v55 = vmax.f32 %v472_v50, 0.0  ;;  %v475_v56 = vadd.f32 %v751_v53, %v988_v17  ;;  %v466_v57 = vpop.f32.mrb[11].mxu1 }
 0x21c   :  { %v467_v59 = vadd.f32 %v988_v17, %v466_v57  ;;  %541 = vadd.xlane.f32.xlu0 %v521_v54  ;;  %v502_v62 = vmax.f32 %v464_v52, 0.0 }
 0x21d   :  { %v505_v60 = vmax.f32 %v475_v56, 0.0  ;;  %543 = vadd.xlane.f32.xlu1 %v522_v58  ;;  %v527_v61 = vmul.f32 %v995_v23, %v504_v55 }
 0x21e   :  { %v503_v63 = vmax.f32 %v467_v59, 0.0  ;;  %v525_v6 = vmul.f32 %v995_v23, %v502_v62 }
 0x21f   :  { %v528_v0 = vmul.f32 %v995_v23, %v505_v60 }
 0x220   :  { %v754_v1 = vpop.f32.mrb[12].mxu1  ;;  %553 = vadd.xlane.f32.xlu0 %v527_v61  ;;  %v526_v8 = vmul.f32 %v995_v23, %v503_v63 }
 0x221   :  { %v479_v2 = vpop.f32.mrb[13].mxu1  ;;  %555 = vadd.xlane.f32.xlu1 %v528_v0  ;;  %v488_v3 = vadd.f32 %v754_v1, %v988_v17 }
 0x222   :  { %v480_v4 = vadd.f32 %v988_v17, %v479_v2  ;;  %v755_v5 = vpop.f32.mrb[14].mxu1 }
 0x223   :  { %v482_v7 = vpop.f32.mrb[15].mxu1  ;;  %v491_v10 = vadd.f32 %v755_v5, %v988_v17  ;;  %v508_v12 = vmax.f32 %v488_v3, 0.0 }
 0x224   :  { %v506_v9 = vmax.f32 %v480_v4, 0.0  ;;  %v483_v11 = vadd.f32 %v988_v17, %v482_v7  ;;  %549 = vadd.xlane.f32.xlu0 %v525_v6  ;;  %v1030_v17 = vstv %s1066_s6  ;;  %s887_s6 = smov [#allocation9]  }
 0x225   :  { %551 = vadd.xlane.f32.xlu1 %v526_v8  ;;  %v509_v15 = vmax.f32 %v491_v10, 0.0  ;;  %v531_v18 = vmul.f32 %v995_v23, %v508_v12  ;;  %s620_s18 = sshll.u32 %s887_s6, 4  ;;  %s621_s18 = int_to_ptr.vmem [resolvable:$true] %s620_s18 }
 0x226   :  { %v507_v13 = vmax.f32 %v483_v11, 0.0  ;;  %v529_v14 = vmul.f32 %v995_v23, %v506_v9  ;;  %s854_s19 = scalar_lea.vmem %s621_s18, 2048  ;;  %p859_p11 = scmp.lt.s32.totalorder %s621_s18, %s621_s18 }
 0x227   :  { %v532_v19 = vmul.f32 %v995_v23, %v509_v15  ;;  %p855_p10 = scmp.ne.s32.totalorder %s621_s18, %s854_s19  ;;  %p860_p12 = scmp.lt.s32.totalorder %s854_s19, %s854_s19 }
 0x228   :  { %557 = vadd.xlane.f32.xlu0 %v529_v14  ;;  %v530_v16 = vmul.f32 %v995_v23, %v507_v13 }
 0x229   :  { %p861_p13 = por %p860_p12, %p859_p11 }
 0x22a   :  { %559 = vadd.xlane.f32.xlu1 %v530_v16 }
 0x22b   :  { %p862_p0 = pnand %p861_p13, %p855_p10 }
 0x22c   :  { %561 = vadd.xlane.f32.xlu0 %v531_v18 }
 0x22e   :  { %563 = vadd.xlane.f32.xlu1 %v532_v19 }
 0x29c   :  { %v538_v20 = vpop.xlane.xlu1 %537 }
 0x29d   :  { %v569_v21 = vadd.f32 %v1030_v17, %v538_v20  ;;  %v534_v22 = vpop.xlane.xlu0 %533 }
 0x29e   :  { %v567_v24 = vadd.f32 %v1030_v17, %v534_v22 }
 0x29f   :  { %v585_v25 = vmax.f32 %v569_v21, 0.0 }
 0x2a0   :  { %v583_v26 = vmax.f32 %v567_v24, 0.0  ;;  %v540_v27 = vpop.xlane.xlu1 %539 }
 0x2a1   :  { %601 = vst [vmem:[#allocation9 + $0x10] sm:$0xff] %v585_v25  ;;  %v570_v28 = vadd.f32 %v1030_v17, %v540_v27  ;;  %v536_v29 = vpop.xlane.xlu0 %535 }
 0x2a2   :  { %599 = vst [vmem:[#allocation9] sm:$0xff] %v583_v26  ;;  %v568_v23 = vadd.f32 %v1030_v17, %v536_v29 }
 0x2a3   :  { %v586_v30 = vmax.f32 %v570_v28, 0.0 }
 0x2a4   :  { %v584_v31 = vmax.f32 %v568_v23, 0.0 }
 0x2a5   :  { %602 = vst [vmem:[#allocation9 + $0x18] sm:$0xff] %v586_v30  ;;  %v546_v32 = vpop.xlane.xlu0 %545 }
 0x2a6   :  { %600 = vst [vmem:[#allocation9 + $0x8] sm:$0xff] %v584_v31  ;;  %v573_v33 = vadd.f32 %v1030_v17, %v546_v32  ;;  %v548_v34 = vpop.xlane.xlu1 %547 }
 0x2a7   :  { %v574_v35 = vadd.f32 %v1030_v17, %v548_v34 }
 0x2a8   :  { %v589_v36 = vmax.f32 %v573_v33, 0.0 }
 0x2a9   :  { %v590_v37 = vmax.f32 %v574_v35, 0.0  ;;  %v542_v38 = vpop.xlane.xlu0 %541 }
 0x2aa   :  { %605 = vst [vmem:[#allocation9 + $0x30] sm:$0xff] %v589_v36  ;;  %v571_v39 = vadd.f32 %v1030_v17, %v542_v38  ;;  %v544_v40 = vpop.xlane.xlu1 %543 }
 0x2ab   :  { %606 = vst [vmem:[#allocation9 + $0x38] sm:$0xff] %v590_v37  ;;  %v572_v41 = vadd.f32 %v1030_v17, %v544_v40 }
 0x2ac   :  { %v587_v42 = vmax.f32 %v571_v39, 0.0 }
 0x2ad   :  { %v588_v43 = vmax.f32 %v572_v41, 0.0  ;;  %v554_v44 = vpop.xlane.xlu0 %553 }
 0x2ae   :  { %603 = vst [vmem:[#allocation9 + $0x20] sm:$0xff] %v587_v42  ;;  %v577_v45 = vadd.f32 %v1030_v17, %v554_v44  ;;  %v556_v46 = vpop.xlane.xlu1 %555 }
 0x2af   :  { %604 = vst [vmem:[#allocation9 + $0x28] sm:$0xff] %v588_v43  ;;  %v578_v47 = vadd.f32 %v1030_v17, %v556_v46 }
 0x2b0   :  { %v593_v48 = vmax.f32 %v577_v45, 0.0 }
 0x2b1   :  { %v594_v49 = vmax.f32 %v578_v47, 0.0  ;;  %v550_v50 = vpop.xlane.xlu0 %549 }
 0x2b2   :  { %609 = vst [vmem:[#allocation9 + $0x50] sm:$0xff] %v593_v48  ;;  %v575_v51 = vadd.f32 %v1030_v17, %v550_v50  ;;  %v552_v52 = vpop.xlane.xlu1 %551 }
 0x2b3   :  { %610 = vst [vmem:[#allocation9 + $0x58] sm:$0xff] %v594_v49  ;;  %v576_v53 = vadd.f32 %v1030_v17, %v552_v52 }
 0x2b4   :  { %v591_v54 = vmax.f32 %v575_v51, 0.0 }
 0x2b5   :  { %v592_v55 = vmax.f32 %v576_v53, 0.0  ;;  %v558_v56 = vpop.xlane.xlu0 %557 }
 0x2b6   :  { %607 = vst [vmem:[#allocation9 + $0x40] sm:$0xff] %v591_v54  ;;  %v579_v57 = vadd.f32 %v1030_v17, %v558_v56 }
 0x2b7   :  { %608 = vst [vmem:[#allocation9 + $0x48] sm:$0xff] %v592_v55  ;;  %v560_v58 = vpop.xlane.xlu1 %559 }
 0x2b8   :  { %v595_v59 = vmax.f32 %v579_v57, 0.0  ;;  %v580_v60 = vadd.f32 %v1030_v17, %v560_v58 }
 0x2b9   :  { %v562_v61 = vpop.xlane.xlu0 %561 }
 0x2ba   :  { %611 = vst [vmem:[#allocation9 + $0x60] sm:$0xff] %v595_v59  ;;  %v596_v62 = vmax.f32 %v580_v60, 0.0  ;;  %v581_v63 = vadd.f32 %v1030_v17, %v562_v61 }
 0x2bb   :  { %v564_v0 = vpop.xlane.xlu1 %563 }
 0x2bc   :  { %612 = vst [vmem:[#allocation9 + $0x68] sm:$0xff] %v596_v62  ;;  %v597_v1 = vmax.f32 %v581_v63, 0.0  ;;  %v582_v2 = vadd.f32 %v1030_v17, %v564_v0 }
 0x2be   :  { %613 = vst [vmem:[#allocation9 + $0x70] sm:$0xff] %v597_v1  ;;  %v598_v3 = vmax.f32 %v582_v2, 0.0 }
 0x2c0   :  { %614 = vst [vmem:[#allocation9 + $0x78] sm:$0xff] %v598_v3 }
 0x2c1   :  { %865 = shalt.err (!%p862_p0)
}
 0x2c2   :  { %s866_s22 = scalar_lea.hbm %s1067_s7, 2048 }
 0x2c3   :  { %p867_p1 = scmp.ne.s32.totalorder %s1067_s7, %s866_s22  ;;  %p870_p2 = scmp.lt.u32.totalorder %s866_s22, %s1067_s7 }
 0x2c5   :  { %p872_p3 = pnand %p870_p2, %p867_p1 }
 0x2c7   :  { %875 = shalt.err (!%p872_p3)
}
 0x2c8   :  { %s888_s26 = smov 128   ;;  %s889_s28 = smov 8  }
 0x2c9   :  { %626 = dma.vmem_to_hbm [thread:$0]  %s621_s18, 2048, %s1067_s7, [#allocation5], %s888_s26, %s888_s26, %s889_s28  }
 0x2ca   :  { %880 = dma.done.wait [#allocation5], 2048  }
 0x2cb   :  { %881 = vsyncadd [#allocation5], 4294965248 }
 0x2cc   :  { %630 = vsyncpa [#allocation4], 1 }
 0x2cd   :  { %631 = vsyncpa [#allocation7], 1 }
 0x2ce   :  { %632 = vsyncpa [#allocation5], 1 }

</bundles_post_ra>
